<compile_context>
chip_gen: v5e
topology: v5e:2x2
jax: 0.10.0
libtpu: 0.0.40
codegen_flags: <defaults>
</compile_context>

<pallas_src>
import functools
import random

import jax
import jax.numpy as jnp
from jax import lax
from jax.experimental import pallas as pl
from jax.experimental.pallas import tpu as pltpu

_LANE = 128
_MAX_BLOCK_ROWS = 4096  # (4096, 128) f32 tile = 2 MiB


def _round_up(n, m):
    return pl.cdiv(n, m) * m


def _sublane_multiple(dtype):
    # Minimum second-minor tile: 8 for 4-byte, 16 for 2-byte, 32 for 1-byte.
    itemsize = jnp.dtype(dtype).itemsize
    return max(8, 32 // max(1, itemsize))


def _mix(v, m1, m2):
    """murmur3-style 32-bit finalizer (uint32 in, uint32 out)."""
    v = v ^ (v >> 16)
    v = v * m1
    v = v ^ (v >> 15)
    v = v * m2
    v = v ^ (v >> 16)
    return v


def _noise_kernel(seed_ref, x_ref, o_ref, *, noise_level):
    """seed_ref: SMEM (1,) int32 pre-mixed seed (scalar prefetch).
    x_ref:  VMEM (block_rows, 128) tile in the original dtype.
    o_ref:  VMEM (block_rows, 128) tile in the original dtype."""
    block_rows, lane = x_ref.shape

    # Global flat element index for this tile (counter-based PRNG: noise is a
    # pure function of (seed, index), independent of tiling / which core runs).
    row = lax.broadcasted_iota(jnp.int32, (block_rows, lane), 0)
    col = lax.broadcasted_iota(jnp.int32, (block_rows, lane), 1)
    idx = (pl.program_id(0) * block_rows + row) * lane + col

    key = seed_ref[0].astype(jnp.uint32)
    v = idx.astype(jnp.uint32) + key
    v = _mix(v, jnp.uint32(0x7FEB352D), jnp.uint32(0x846CA68B))
    v = _mix(v ^ key, jnp.uint32(0xCC9E2D51), jnp.uint32(0x1B873593))

    # Uniform in (0, 1) from the top 24 bits.
    u = ((v >> 8).astype(jnp.int32).astype(jnp.float32) + 0.5) * jnp.float32(2.0 ** -24)

    # Inverse normal CDF (Abramowitz & Stegun 26.2.23): log + sqrt + div only.
    p = jnp.minimum(u, 1.0 - u)
    t = jnp.sqrt(-2.0 * jnp.log(p))
    num = 2.515517 + t * (0.802853 + t * 0.010328)
    den = 1.0 + t * (1.432788 + t * (0.189269 + t * 0.001308))
    z = t - num / den
    z = jnp.where(u < 0.5, -z, z)

    x = x_ref[...].astype(jnp.float32)
    o_ref[...] = (x + jnp.float32(noise_level) * z).astype(o_ref.dtype)


@functools.partial(jax.jit, static_argnames=("noise_level", "block_rows"))
def _add_noise_2d(x2d, seed_arr, *, noise_level, block_rows):
    rows, lane = x2d.shape
    grid = (pl.cdiv(rows, block_rows),)  # partial last block is masked by Pallas
    return pl.pallas_call(
        functools.partial(_noise_kernel, noise_level=noise_level),
        out_shape=jax.ShapeDtypeStruct((rows, lane), x2d.dtype),
        grid_spec=pltpu.PrefetchScalarGridSpec(
            num_scalar_prefetch=1,
            grid=grid,
            in_specs=[pl.BlockSpec((block_rows, lane), lambda i, seed: (i, 0))],
            out_specs=pl.BlockSpec((block_rows, lane), lambda i, seed: (i, 0)),
        ),
        compiler_params=pltpu.CompilerParams(
            dimension_semantics=("parallel",),
            vmem_limit_bytes=32 * 1024 * 1024,
        ),
    )(seed_arr, x2d)


class RandomNoiseInjectionPallas:
    """Injects random Gaussian noise: out = x + randn_like(x) * noise_level."""

    def __init__(self, noise_level=0.05):
        self.noise_level = float(noise_level)

    def __call__(self, x, seed=None):
        if seed is None:
            # TODO(synk): the torch reference uses torch's global RNG for
            # randn_like; here only the seed draw is host-side — the Gaussian
            # sampling itself runs inside the kernel (counter-based hash PRNG).
            seed = random.randint(0, 2 ** 31 - 1)

        x = jnp.asarray(x)
        orig_shape = x.shape
        total = int(x.size)
        if total == 0:
            return x

        sub = _sublane_multiple(x.dtype)
        rows = pl.cdiv(total, _LANE)
        rows_padded = _round_up(rows, sub)        # minimal pad only
        padded_total = rows_padded * _LANE

        x_flat = jnp.ravel(x)
        needs_pad = padded_total != total
        if needs_pad:
            x_flat = jnp.pad(x_flat, (0, padded_total - total))
        x2d = x_flat.reshape(rows_padded, _LANE)

        # Big tiles to amortize the ~0.35us/step overhead, but aim for >= 2
        # grid steps when possible so v7x megacore can use both TensorCores.
        half = _round_up(pl.cdiv(rows_padded, 2), sub)
        block_rows = max(sub, min(_MAX_BLOCK_ROWS, half, rows_padded))

        # Pre-mix the seed host-side (golden-ratio spread), kernel just loads it.
        mixed = (int(seed) * 0x9E3779B9 + 0x85EBCA6B) & 0xFFFFFFFF
        if mixed >= (1 << 31):
            mixed -= 1 << 32
        seed_arr = jnp.asarray([mixed], dtype=jnp.int32)

        out2d = _add_noise_2d(
            x2d, seed_arr, noise_level=self.noise_level, block_rows=block_rows
        )
        if needs_pad:
            return out2d.reshape(-1)[:total].reshape(orig_shape)
        return out2d.reshape(orig_shape)


if __name__ == "__main__":
    random.seed(0)  # deterministic host-side seed draw (mirrors global-RNG usage)

    key = jax.random.PRNGKey(0)
    x = jax.random.uniform(key, (2, 4, 16, 16), dtype=jnp.float32)  # NCHW

    module = RandomNoiseInjectionPallas(noise_level=0.05)
    out = module(x, seed=0)
    out = jax.block_until_ready(out)

    assert out.shape == x.shape and out.dtype == x.dtype
    assert bool(jnp.all(jnp.isfinite(out)))

    # Sanity: injected noise is small, roughly zero-mean, std ~= noise_level.
    diff = (out - x).astype(jnp.float32)
    assert float(jnp.max(jnp.abs(diff))) < 1.0
    assert abs(float(jnp.mean(diff))) < 0.01
    dstd = float(jnp.std(diff))
    assert 0.02 < dstd < 0.09, dstd

    print("KERNEL_OK")
</pallas_src>

<mosaic_0001>
module attributes {stable_mosaic.version = 11 : i64} {
  func.func @_noise_kernel(%arg0: i32, %arg1: memref<1xi32, #tpu.memory_space<smem>>, %arg2: memref<8x128xf32, #tpu.memory_space<vmem>>, %arg3: memref<8x128xf32, #tpu.memory_space<vmem>>) attributes {dimension_semantics = [#tpu.dimension_semantics<parallel>], iteration_bounds = array<i64: 2>, scalar_prefetch = 1 : i64, scratch_operands = 0 : i64, tpu.core_type = #tpu.core_type<tc>, window_params = [{transform_indices = @transform_0, window_bounds = array<i64: 8, 128>}, {transform_indices = @transform_1, window_bounds = array<i64: 8, 128>}]} {
    %0 = tpu.iota {dimensions = array<i32: 0>} : vector<8x128xi32>
    %1 = tpu.iota {dimensions = array<i32: 1>} : vector<8x128xi32>
    %c8_i32 = arith.constant 8 : i32
    %2 = arith.muli %arg0, %c8_i32 : i32
    %3 = vector.broadcast %2 : i32 to vector<8x128xi32>
    %4 = arith.addi %3, %0 : vector<8x128xi32>
    %c128_i32 = arith.constant 128 : i32
    %5 = vector.broadcast %c128_i32 : i32 to vector<8x128xi32>
    %6 = arith.muli %4, %5 : vector<8x128xi32>
    %7 = arith.addi %6, %1 : vector<8x128xi32>
    %c0 = arith.constant 0 : index
    %8 = memref.load %arg1[%c0] : memref<1xi32, #tpu.memory_space<smem>>
    %9 = vector.broadcast %8 : i32 to vector<8x128xi32>
    %10 = arith.addi %7, %9 : vector<8x128xi32>
    %c16_i32 = arith.constant 16 : i32
    %11 = vector.broadcast %c16_i32 : i32 to vector<8x128xi32>
    %12 = arith.shrui %10, %11 : vector<8x128xi32>
    %13 = arith.xori %10, %12 : vector<8x128xi32>
    %c2146121005_i32 = arith.constant 2146121005 : i32
    %14 = vector.broadcast %c2146121005_i32 : i32 to vector<8x128xi32>
    %15 = arith.muli %13, %14 : vector<8x128xi32>
    %c15_i32 = arith.constant 15 : i32
    %16 = vector.broadcast %c15_i32 : i32 to vector<8x128xi32>
    %17 = arith.shrui %15, %16 : vector<8x128xi32>
    %18 = arith.xori %15, %17 : vector<8x128xi32>
    %c-2073254261_i32 = arith.constant -2073254261 : i32
    %19 = vector.broadcast %c-2073254261_i32 : i32 to vector<8x128xi32>
    %20 = arith.muli %18, %19 : vector<8x128xi32>
    %c16_i32_0 = arith.constant 16 : i32
    %21 = vector.broadcast %c16_i32_0 : i32 to vector<8x128xi32>
    %22 = arith.shrui %20, %21 : vector<8x128xi32>
    %23 = arith.xori %20, %22 : vector<8x128xi32>
    %24 = vector.broadcast %8 : i32 to vector<8x128xi32>
    %25 = arith.xori %23, %24 : vector<8x128xi32>
    %c16_i32_1 = arith.constant 16 : i32
    %26 = vector.broadcast %c16_i32_1 : i32 to vector<8x128xi32>
    %27 = arith.shrui %25, %26 : vector<8x128xi32>
    %28 = arith.xori %25, %27 : vector<8x128xi32>
    %c-862048943_i32 = arith.constant -862048943 : i32
    %29 = vector.broadcast %c-862048943_i32 : i32 to vector<8x128xi32>
    %30 = arith.muli %28, %29 : vector<8x128xi32>
    %c15_i32_2 = arith.constant 15 : i32
    %31 = vector.broadcast %c15_i32_2 : i32 to vector<8x128xi32>
    %32 = arith.shrui %30, %31 : vector<8x128xi32>
    %33 = arith.xori %30, %32 : vector<8x128xi32>
    %c461845907_i32 = arith.constant 461845907 : i32
    %34 = vector.broadcast %c461845907_i32 : i32 to vector<8x128xi32>
    %35 = arith.muli %33, %34 : vector<8x128xi32>
    %c16_i32_3 = arith.constant 16 : i32
    %36 = vector.broadcast %c16_i32_3 : i32 to vector<8x128xi32>
    %37 = arith.shrui %35, %36 : vector<8x128xi32>
    %38 = arith.xori %35, %37 : vector<8x128xi32>
    %c8_i32_4 = arith.constant 8 : i32
    %39 = vector.broadcast %c8_i32_4 : i32 to vector<8x128xi32>
    %40 = arith.shrui %38, %39 : vector<8x128xi32>
    %41 = arith.sitofp %40 : vector<8x128xi32> to vector<8x128xf32>
    %cst = arith.constant 5.000000e-01 : f32
    %42 = vector.broadcast %cst : f32 to vector<8x128xf32>
    %43 = arith.addf %41, %42 : vector<8x128xf32>
    %cst_5 = arith.constant 5.96046448E-8 : f32
    %44 = vector.broadcast %cst_5 : f32 to vector<8x128xf32>
    %45 = arith.mulf %43, %44 : vector<8x128xf32>
    %cst_6 = arith.constant 1.000000e+00 : f32
    %46 = vector.broadcast %cst_6 : f32 to vector<8x128xf32>
    %47 = arith.subf %46, %45 : vector<8x128xf32>
    %48 = arith.minimumf %45, %47 : vector<8x128xf32>
    %49 = math.log %48 : vector<8x128xf32>
    %cst_7 = arith.constant -2.000000e+00 : f32
    %50 = vector.broadcast %cst_7 : f32 to vector<8x128xf32>
    %51 = arith.mulf %50, %49 : vector<8x128xf32>
    %52 = math.sqrt %51 : vector<8x128xf32>
    %cst_8 = arith.constant 1.032800e-02 : f32
    %53 = vector.broadcast %cst_8 : f32 to vector<8x128xf32>
    %54 = arith.mulf %52, %53 : vector<8x128xf32>
    %cst_9 = arith.constant 0.802852988 : f32
    %55 = vector.broadcast %cst_9 : f32 to vector<8x128xf32>
    %56 = arith.addf %55, %54 : vector<8x128xf32>
    %57 = arith.mulf %52, %56 : vector<8x128xf32>
    %cst_10 = arith.constant 2.515517 : f32
    %58 = vector.broadcast %cst_10 : f32 to vector<8x128xf32>
    %59 = arith.addf %58, %57 : vector<8x128xf32>
    %cst_11 = arith.constant 1.308000e-03 : f32
    %60 = vector.broadcast %cst_11 : f32 to vector<8x128xf32>
    %61 = arith.mulf %52, %60 : vector<8x128xf32>
    %cst_12 = arith.constant 1.892690e-01 : f32
    %62 = vector.broadcast %cst_12 : f32 to vector<8x128xf32>
    %63 = arith.addf %62, %61 : vector<8x128xf32>
    %64 = arith.mulf %52, %63 : vector<8x128xf32>
    %cst_13 = arith.constant 1.43278801 : f32
    %65 = vector.broadcast %cst_13 : f32 to vector<8x128xf32>
    %66 = arith.addf %65, %64 : vector<8x128xf32>
    %67 = arith.mulf %52, %66 : vector<8x128xf32>
    %cst_14 = arith.constant 1.000000e+00 : f32
    %68 = vector.broadcast %cst_14 : f32 to vector<8x128xf32>
    %69 = arith.addf %68, %67 : vector<8x128xf32>
    %70 = arith.divf %59, %69 : vector<8x128xf32>
    %71 = arith.subf %52, %70 : vector<8x128xf32>
    %cst_15 = arith.constant 5.000000e-01 : f32
    %72 = vector.broadcast %cst_15 : f32 to vector<8x128xf32>
    %73 = arith.cmpf olt, %45, %72 : vector<8x128xf32>
    %cst_16 = arith.constant 0.000000e+00 : f32
    %74 = vector.broadcast %cst_16 : f32 to vector<8x128xf32>
    %75 = arith.subf %74, %71 : vector<8x128xf32>
    %76 = arith.select %73, %75, %71 : vector<8x128xi1>, vector<8x128xf32>
    %c0_17 = arith.constant 0 : index
    %c0_18 = arith.constant 0 : index
    %77 = vector.load %arg2[%c0_17, %c0_18] : memref<8x128xf32, #tpu.memory_space<vmem>>, vector<8x128xf32>
    %cst_19 = arith.constant 5.000000e-02 : f32
    %78 = vector.broadcast %cst_19 : f32 to vector<8x128xf32>
    %79 = arith.mulf %78, %76 : vector<8x128xf32>
    %80 = arith.addf %77, %79 : vector<8x128xf32>
    %c0_20 = arith.constant 0 : index
    %c0_21 = arith.constant 0 : index
    %81 = vector.load %arg3[%c0_20, %c0_21] : memref<8x128xf32, #tpu.memory_space<vmem>>, vector<8x128xf32>
    tpu.vector_store %arg3[%c0_20, %c0_21], %80 {strides = array<i32>} : memref<8x128xf32, #tpu.memory_space<vmem>>, vector<8x128xf32>,
    return
  }
  func.func @transform_0(%arg0: i32, %arg1: memref<1xi32, #tpu.memory_space<smem>>) -> (i32, i32) {
    %c0_i32 = arith.constant 0 : i32
    %c0_i32_0 = arith.constant 0 : i32
    return %arg0, %c0_i32 : i32, i32
  }
  func.func @transform_1(%arg0: i32, %arg1: memref<1xi32, #tpu.memory_space<smem>>) -> (i32, i32) {
    %c0_i32 = arith.constant 0 : i32
    %c0_i32_0 = arith.constant 0 : i32
    return %arg0, %c0_i32 : i32, i32
  }
}

</mosaic_0001>

<bundles_post_ra>
// kernel: _add_noise_2d.1
= control target key start
LH: loop header
LB: loop body
LE: loop exit
PB: predicated region body
PF: predicated region fallthrough
CT: control target
= control target key end

     0   :  { %s624_s0 = inlined_call_operand.<no memory space> [shape: s32[1], index: 0, kind: input, shape index: {}]   ;;  %s625_s1 = inlined_call_operand.hbm [shape: f32[16,128], index: 1, kind: input, shape index: {}]   ;;  %s626_s2 = inlined_call_operand.hbm [shape: f32[16,128], index: 2, kind: output, shape index: {}]  }
   0x1   :  { %7 = sst [smem:[#allocation3]] %s624_s0 }
   0x2   :  { %8 = vsyncpa [#allocation5], 0 }
   0x3   :  { %10 = vsyncpa [#allocation5 + $0x1], 0 }
   0x4   :  { %11 = vsyncpa [#allocation6], 0 }
   0x5   :  { %13 = vsyncpa [#allocation6 + $0x1], 0  ;;  %s486_s11 = smov 0   ;;  %s488_s12 = smov 0  }
   0x6   :  { %s490_s13 = smov 0   ;;  %s492_s14 = smov 0  }
   0x7 LB: > { %s507_s0 = sadd.s32 4294967295, %s466_s14   ;;  %s305_s15 = sadd.s32 4294967294, %s466_s14   ;;  %s466_s14 = sphi %s492_s14, %s636_s14   ;;  %s462_s13 = sphi %s490_s13, %s635_s13   ;;  %s458_s12 = sphi %s488_s12, %s634_s12   ;;  %s454_s11 = sphi %s486_s11, %s633_s11  }
   0x8   : > { %s511_s16 = sadd.s32 1, %s466_s14   ;;  %s26_s17 = sadd.s32 1, %s462_s13 }
   0x9   : > { %s23_s18 = ssub.s32 %s466_s14, %s511_s16  ;;  %p33_p0 = scmp.ne.s32.totalorder %s462_s13, %s458_s12 }
   0xa   : > { %p24_p1 = scmp.eq.s32.totalorder %s23_s18, 0  ;;  %p34_p2 = scmp.eq.s32.totalorder %s466_s14, 0 }
   0xb   : > { %p39_p3 = scmp.ne.s32.totalorder %s458_s12, %s454_s11  ;;  %p40_p4 = scmp.eq.s32.totalorder %s507_s0, 0 }
   0xc   : > { %s523_s19 = scalar_select %p24_p1, %s462_s13, %s26_s17  }
   0xd   : > { %p525_p5 = por %p34_p2, %p33_p0  ;;  %p529_p6 = por %p40_p4, %p39_p3 }
   0xe   : > { %p63_p7 = scmp.eq.s32.totalorder %s507_s0, 1  ;;  %p69_p8 = scmp.eq.s32.totalorder %s305_s15, 1 }
   0xf   : > { %p330_p10 = scmp.lt.s32.totalorder %s466_s14, 2  ;;  %s89_s24 = sand.u32 1, %s462_s13  }
  0x10   : > { %p536_p11 = por %p63_p7, %p33_p0  ;;  %p540_p12 = por %p69_p8, %p39_p3 }
  0x11   : > { %s309_s25 = sshll.u32 %s466_s14, 3  ;;  %s308_s26 = sshll.u32 %s89_s24, 3 }
  0x12   : > { %s97_s29 = scalar_lea.hbm %s625_s1, %s309_s25  ;;  %s93_s3 = scalar_lea.vmem [#allocation4], %s308_s26 }
  0x13   : > { %s99_s30 = sshll.u32 %s97_s29, 4  ;;  %s101_s4 = sshll.u32 %s93_s3, 4  ;;  %s100_s30 = int_to_ptr.hbm [resolvable:$true] %s99_s30  ;;  %s102_s4 = int_to_ptr.vmem [resolvable:$true] %s101_s4 }
  0x14   : > { %p551_p13 = pnand %p330_p10, %p525_p5  ;;  %p310_p0 = scmp.ge.s32.totalorder %s466_s14, 1 }
  0x15   : > { %p106_p1 = scmp.lt.s32.totalorder %s466_s14, 3  ;;  %s90_s6 = scalar_lea.sflag [#allocation5], %s89_s24 }
  0x16   : > { %s370_s7 = sshra.s32 %s100_s30, 4  ;;  %p374_p3 = pneg %p551_p13  ;;  %s371_s7 = int_to_ptr.hbm [resolvable:$true] %s370_s7 }
  0x17   : > { %s372_s8 = scalar_lea.hbm %s371_s7, 8  ;;  %s377_s15 = scalar_lea.hbm %s625_s1, 16 }
  0x18   : > { %p373_p2 = scmp.ne.s32.totalorder %s371_s7, %s372_s8  ;;  %p378_p5 = scmp.lt.s32.totalorder %s371_s7, %s625_s1 }
  0x19   : > { %p379_p8 = scmp.lt.s32.totalorder %s377_s15, %s372_s8 }
  0x1a   : > { %p375_p4 = pnand %p374_p3, %p373_p2 }
  0x1b   : > { %p380_p10 = por %p379_p8, %p378_p5 }
  0x1c   : > { %p376_p7 = pneg %p375_p4 }
  0x1e   : > { %p381_p9 = pnand %p380_p10, %p376_p7 }
  0x20   : > { %384 = shalt.err (!%p381_p9)
}
  0x21   : > { %325 = dma.hbm_to_vmem [thread:$0]  (!%p551_p13), %s100_s30, 128, %s102_s4, %s90_s6  }
  0x22   : > { %p107_p2 = pnand %p310_p0, %p106_p1 }
  0x23   : > { %s572_s20 = sand.u32 (!%p107_p2), 1, %s458_s12  }
  0x24   : > { %110 = sbr.rel (%p107_p2) target bundleno = 175 (0xaf), region = 24  ;;  %s311_s24 = sshll.u32 (!%p107_p2), %s572_s20, 3 }
  0x25   : > { %s113_s25 = scalar_lea.sflag (!%p107_p2), [#allocation5], %s572_s20  ;;  %s578_s26 = scalar_lea.vmem (!%p107_p2), [#allocation4], %s311_s24 }
  0x29   : > { %445 = dma.done.wait (%p529_p6), %s113_s25, 128  }
  0x2a   : > { %447 = vsyncadd (%p529_p6), %s113_s25, 4294967168  ;;  %v136_v0 = vlaneseq  ;;  %s313_s27 = sshll.u32 %s507_s0, 3  ;;  %s145_s28 = sld [smem:[#allocation3]] }
  0x2b   : > { %v141_v1 = vstv %s313_s27  ;;  %s230_s30 = scalar_lea.hbm %s626_s2, %s313_s27  ;;  %s135_s3 = scalar_lea.vmem [#allocation7], %s311_s24 }
  0x2c   : > { %v137_v2 = vshrl.u32 %v136_v0, 7  ;;  %v139_v3 = vand.u32 127, %v136_v0  ;;  %s232_s4 = sshll.u32 %s135_s3, 4  ;;  %s234_s5 = sshll.u32 %s230_s30, 4  ;;  %s233_s4 = int_to_ptr.vmem [resolvable:$true] %s232_s4  ;;  %s235_s5 = int_to_ptr.hbm [resolvable:$true] %s234_s5 }
  0x2d   : > { %s220_s6 = scalar_lea.sflag [#allocation6], %s572_s20  ;;  %s414_s7 = sshra.s32 %s235_s5, 4  ;;  %s415_s7 = int_to_ptr.hbm [resolvable:$true] %s414_s7 }
  0x2e   : > { %v142_v4 = vadd.s32 %v141_v1, %v137_v2  ;;  %s416_s0 = scalar_lea.hbm %s415_s7, 8  ;;  %s420_s10 = scalar_lea.hbm %s626_s2, 16 }
  0x2f   : > { %p417_p6 = scmp.ne.s32.totalorder %s415_s7, %s416_s0  ;;  %p421_p0 = scmp.lt.s32.totalorder %s415_s7, %s626_s2 }
  0x30   : > { %v143_v5 = vmul.u32 128, %v142_v4  ;;  %v146_v6 = vstv %s145_s28  ;;  %p422_p1 = scmp.lt.s32.totalorder %s420_s10, %s416_s0 }
  0x31   : > { %p418_p9 = pnand %p417_p6, %p536_p11 }
  0x32   : > { %v144_v7 = vadd.s32 %v143_v5, %v139_v3  ;;  %v215_v5 = vld [vmem:[%s578_s26] sm:$0xff]  ;;  %p423_p3 = por %p422_p1, %p421_p0 }
  0x33   : > { %p419_p13 = pneg %p418_p9 }
  0x34   : > { %v147_v8 = vadd.s32 %v146_v6, %v144_v7 }
  0x35   : > { %p424_p4 = pnand %p423_p3, %p419_p13 }
  0x36   : > { %v148_v9 = vshrl.u32 %v147_v8, 16 }
  0x38   : > { %v149_v10 = vxor.u32 %v148_v9, %v147_v8 }
  0x3a   : > { %v150_v11 = vmul.u32 2146121005, %v149_v10 }
  0x3c   : > { %v151_v12 = vshrl.u32 %v150_v11, 15 }
  0x3e   : > { %v152_v13 = vxor.u32 %v151_v12, %v150_v11 }
  0x40   : > { %v153_v14 = vmul.u32 2221713035, %v152_v13 }
  0x42   : > { %v154_v15 = vshrl.u32 %v153_v14, 16 }
  0x44   : > { %v155_v16 = vxor.u32 %v154_v15, %v153_v14 }
  0x46   : > { %v156_v17 = vxor.u32 %v155_v16, %v146_v6 }
  0x48   : > { %v157_v18 = vshrl.u32 %v156_v17, 16 }
  0x4a   : > { %v158_v19 = vxor.u32 %v157_v18, %v156_v17 }
  0x4c   : > { %v159_v20 = vmul.u32 3432918353, %v158_v19 }
  0x4e   : > { %v160_v21 = vshrl.u32 %v159_v20, 15 }
  0x50   : > { %v161_v22 = vxor.u32 %v160_v21, %v159_v20 }
  0x52   : > { %v162_v23 = vmul.u32 461845907, %v161_v22 }
  0x54   : > { %v163_v24 = vshrl.u32 %v162_v23, 16 }
  0x56   : > { %v164_v25 = vxor.u32 %v163_v24, %v162_v23 }
  0x58   : > { %v165_v26 = vshrl.u32 %v164_v25, 8 }
  0x5a   : > { %v166_v27 = vcvt.s32.f32 %v165_v26 }
  0x5c   : > { %v167_v28 = vadd.f32 0.5, %v166_v27 }
  0x5e   : > { %v168_v29 = vmul.f32 5.9604645e-08, %v167_v28 }
  0x60   : > { %v169_v30 = vsub.f32 1.0, %v168_v29  ;;  %vm212_vm6 = vcmp.lt.f32.partialorder %v168_v29, 0.5 }
  0x62   : > { %v170_v31 = vmin.f32 %v168_v29, %v169_v30 }
  0x64   : > { %364 = vlog2.f32 %v170_v31 }
  0x6a   : > { %v365_v32 = vpop.eup %364 }
  0x6b   : > { %v172_v33 = vmul.f32 0.6931472, %v365_v32 }
  0x6d   : > { %v173_v34 = vmul.f32 -2.0, %v172_v33 }
  0x6f   : > { %366 = vrsqrt.f32 %v173_v34  ;;  %vm181_vm0 = vcmp.eq.f32.partialorder %v173_v34, inf  ;;  %v184_v41 = vand.u32 2147483648, %v173_v34  ;;  %vm183_vm1 = vcmp.eq.f32.partialorder %v173_v34, 0.0 }
  0x75   : > { %v367_v35 = vpop.eup %366 }
  0x76   : > { %v175_v36 = vmul.f32 %v367_v35, %v173_v34 }
  0x78   : > { %v176_v37 = vmul.f32 %v367_v35, %v175_v36 }
  0x7a   : > { %v177_v38 = vmul.f32 0.5, %v176_v37 }
  0x7c   : > { %v178_v39 = vsub.f32 1.5, %v177_v38 }
  0x7e   : > { %v179_v40 = vmul.f32 %v367_v35, %v178_v39 }
  0x80   : > { %v180_v42 = vmul.f32 %v179_v40, %v173_v34 }
  0x82   : > { %v182_v43 = vsel %vm181_vm0, %v173_v34, %v180_v42 }
  0x83   : > { %v185_v44 = vsel %vm183_vm1, %v184_v41, %v182_v43 }
  0x84   : > { %v190_v45 = vmul.f32 0.001308, %v185_v44  ;;  %v186_v51 = vmul.f32 0.010328, %v185_v44 }
  0x86   : > { %v191_v46 = vadd.f32 0.189269, %v190_v45  ;;  %v187_v52 = vadd.f32 0.802853, %v186_v51 }
  0x88   : > { %v192_v47 = vmul.f32 %v191_v46, %v185_v44  ;;  %v188_v55 = vmul.f32 %v187_v52, %v185_v44 }
  0x8a   : > { %v193_v48 = vadd.f32 1.432788, %v192_v47  ;;  %v189_v61 = vadd.f32 2.515517, %v188_v55 }
  0x8c   : > { %v194_v49 = vmul.f32 %v193_v48, %v185_v44 }
  0x8e   : > { %v195_v50 = vadd.f32 1.0, %v194_v49 }
  0x90   : > { %368 = vrcp.f32 %v195_v50  ;;  %v207_v56 = vand.u32 2147483648, %v195_v50  ;;  %vm201_vm2 = vweird.f32 %v195_v50  ;;  %v205_v58 = vand.u32 2147483647, %v195_v50 }
  0x92   : > { %v208_v60 = vor.u32 1.1754944e-38, %v207_v56  ;;  %vm206_vm5 = vcmp.eq.f32.partialorder %v205_v58, 8.507059e+37 }
  0x96   : > { %v369_v53 = vpop.eup %368 }
  0x97   : > { %v197_v54 = vmul.f32 %v369_v53, %v195_v50  ;;  %vm202_vm3 = vweird.f32 %v369_v53 }
  0x98   : > { %vm203_vm4 = vmor %vm201_vm2, %vm202_vm3 }
  0x99   : > { %v198_v57 = vsub.f32 1.0, %v197_v54 }
  0x9b   : > { %v199_v59 = vmul.f32 %v369_v53, %v198_v57 }
  0x9d   : > { %v200_v62 = vadd.f32 %v369_v53, %v199_v59 }
  0x9f   : > { %v204_v63 = vsel %vm203_vm4, %v369_v53, %v200_v62 }
  0xa0   : > { %v209_v0 = vsel %vm206_vm5, %v208_v60, %v204_v63 }
  0xa1   : > { %v210_v1 = vmul.f32 %v209_v0, %v189_v61 }
  0xa3   : > { %v211_v2 = vsub.f32 %v185_v44, %v210_v1 }
  0xa5   : > { %v213_v3 = vsub.f32 0.0, %v211_v2 }
  0xa7   : > { %v214_v4 = vsel %vm212_vm6, %v213_v3, %v211_v2 }
  0xa8   : > { %v216_v6 = vmul.f32 0.05, %v214_v4 }
  0xaa   : > { %v217_v7 = vadd.f32 %v216_v6, %v215_v5 }
  0xac   : > { %218 = vst [vmem:[%s135_s3] sm:$0xff] %v217_v7 }
  0xad   : > { %427 = shalt.err (!%p424_p4)
}
  0xae   : > { %320 = dma.vmem_to_hbm [thread:$0]  (%p536_p11), %s233_s4, 128, %s235_s5, %s220_s6  }
  0xaf PF: > { %s246_s18 = sand.u32 1, %s454_s11   ;;  %p632_p7 = scmp.ge.s32.totalorder %s466_s14, 2 }
  0xb0   : > { %s247_s20 = scalar_lea.sflag [#allocation6], %s246_s18 }
  0xb1   : > { %p327_p5 = pnand %p632_p7, %p540_p12 }
  0xb3   : > { %p328_p8 = pneg %p327_p5 }
  0xb5   : > { %449 = dma.done.wait (%p328_p8), %s247_s20, 128  }
  0xb6   : > { %451 = vsyncadd (%p328_p8), %s247_s20, 4294967168  ;;  %p16_p10 = scmp.ge.s32.totalorder %s511_s16, 4   ;;  %s633_s11 = smov %s458_s12 }
  0xb7   : > { %s634_s12 = smov %s462_s13  ;;  %s635_s13 = smov %s523_s19 }
  0xb8   : > { %s636_s14 = smov %s511_s16  ;;  %18 = sbr.rel (!%p16_p10) target bundleno = 7 (0x7), region = 69 }
  0xbd   :  { %253 = vsyncpa [#allocation5], 1 }
  0xbe   :  { %255 = vsyncpa [#allocation5 + $0x1], 1 }
  0xbf   :  { %256 = vsyncpa [#allocation6], 1 }
  0xc0   :  { %258 = vsyncpa [#allocation6 + $0x1], 1 }

</bundles_post_ra>
